<compile_context>
chip_gen: v7x
topology: tpu7x:2x2x1
jax: 0.10.0
libtpu: 0.0.40
codegen_flags: <defaults>
</compile_context>

<pallas_src>
import functools
import math

import jax
import jax.numpy as jnp
from jax.experimental import pallas as pl
from jax.experimental.pallas import tpu as pltpu


def _round_up(x, m):
    return (x + m - 1) // m * m


@functools.lru_cache(maxsize=None)
def _tpu_config():
    """Per-generation knobs: scoped-VMEM budget, TC count, generation hints."""
    vmem_cap = 128 * 1024 * 1024
    try:
        info = pltpu.get_tpu_info()
        vmem_cap = int(getattr(info, "vmem_capacity_bytes", vmem_cap))
    except Exception:
        pass
    kind = ""
    try:
        kind = jax.devices()[0].device_kind.lower()
    except Exception:
        pass
    is_v7 = ("v7" in kind) or (vmem_cap <= 64 * 1024 * 1024)
    is_v6 = "v6" in kind
    if is_v7:
        # 64 MiB physical VMEM: leave headroom for compiler scratch / pipeline buffers.
        vmem_limit = min(vmem_cap, 52 * 1024 * 1024)
        num_tc = 2
    else:
        # v5e / v6e: 128 MiB physical VMEM -> large tiles are fine.
        vmem_limit = min(vmem_cap, 100 * 1024 * 1024)
        num_tc = 1
    return {"vmem_limit": vmem_limit, "num_tc": num_tc, "is_v6": is_v6, "is_v7": is_v7}


def _pick_tc(T, tb, Hp, vmem_limit):
    """Timesteps per recurrence grid step, sized to the scoped-VMEM budget."""
    per_step = tb * (4 * Hp * 2 + Hp * 2 + 4)          # gates bf16 + out bf16 + mask f32
    resident = Hp * 4 * Hp * 2 * 2 + tb * Hp * 4 * 8   # W_hh buffers + h0/c0/hn/cn/scratch
    budget = int(vmem_limit * 0.6) - resident
    tc = max(1, budget // (2 * per_step))               # x2: double-buffered streams
    tc = min(tc, T, 64)
    if tc >= 8:
        tc = (tc // 4) * 4                               # keep the unrolled body tidy
    return max(int(tc), 1)


# ----------------------------------------------------------------------------
# Pallas kernels
# ----------------------------------------------------------------------------
def matmul_bias_kernel(x_ref, w_ref, b_ref, o_ref, acc_ref):
    """Tiled GEMM + bias. grid=(M/bm, N/bn, K/bk); bf16 MXU inputs, f32 accumulator."""
    @pl.when(pl.program_id(2) == 0)
    def _init():
        acc_ref[...] = jnp.zeros_like(acc_ref)

    acc_ref[...] += jnp.dot(x_ref[...], w_ref[...],
                            preferred_element_type=jnp.float32)

    @pl.when(pl.program_id(2) == pl.num_programs(2) - 1)
    def _finalize():
        o_ref[...] = (acc_ref[...] + b_ref[...]).astype(o_ref.dtype)


def lstm_recurrence_kernel(gx_ref, m_ref, whh_ref, h0_ref, c0_ref,
                           out_ref, hn_ref, cn_ref, h_scr, c_scr,
                           *, hidden_pad, chunk, unroll):
    """LSTM recurrence: one batch block x one chunk of timesteps per grid step.

    gx_ref : (chunk, tb, 4*Hp) bf16  precomputed x @ W_ih + (b_ih+b_hh), gate order i,f,g,o
    m_ref  : (chunk, tb, 1)    f32   1.0 = valid step, 0.0 = padded (packed-sequence mask)
    whh_ref: (Hp, 4*Hp)        bf16  resident recurrent weights
    out bf16; state scratch and final h_n/c_n stay f32.
    """
    t = pl.program_id(1)
    Hp = hidden_pad

    @pl.when(t == 0)                               # (re)seed state per batch block
    def _seed():
        h_scr[...] = h0_ref[...]
        c_scr[...] = c0_ref[...]

    def step(s, carry):
        h, c = carry
        gates = gx_ref[s].astype(jnp.float32) + jnp.dot(
            h.astype(jnp.bfloat16), whh_ref[...], preferred_element_type=jnp.float32)
        # lane-aligned gate slices (Hp is a multiple of 128)
        i_g = jax.nn.sigmoid(gates[:, 0 * Hp:1 * Hp])
        f_g = jax.nn.sigmoid(gates[:, 1 * Hp:2 * Hp])
        g_g = jnp.tanh(gates[:, 2 * Hp:3 * Hp])
        o_g = jax.nn.sigmoid(gates[:, 3 * Hp:4 * Hp])
        c_new = f_g * c + i_g * g_g
        h_new = o_g * jnp.tanh(c_new)
        valid = m_ref[s] > 0.0                     # (tb, 1) bool -> single vselect per use
        out_ref[s] = jnp.where(valid, h_new, 0.0).astype(out_ref.dtype)
        h = jnp.where(valid, h_new, h)             # freeze state past sequence length
        c = jnp.where(valid, c_new, c)
        return h, c

    h, c = jax.lax.fori_loop(0, chunk, step, (h_scr[...], c_scr[...]), unroll=unroll)
    h_scr[...] = h
    c_scr[...] = c

    @pl.when(t == pl.num_programs(1) - 1)          # final-state write only once
    def _finalize():
        hn_ref[...] = h
        cn_ref[...] = c


# ----------------------------------------------------------------------------
# Wrappers
# ----------------------------------------------------------------------------
def matmul_bias(x, w, b, *, out_dtype=jnp.float32, vmem_limit=64 * 1024 * 1024):
    """(M, K) @ (K, N) + b -> (M, N) out_dtype.

    Operands are expected pre-prepared (no per-call weight pad/cast): x bf16, w bf16 with
    N % 128 == 0, b f32 of shape (1, N).  If K is not 128-aligned (small embedding dim) a
    single full-extent K block is used instead of padding K.
    """
    M, K = x.shape
    Kw, N = w.shape
    assert K == Kw and N % 128 == 0 and b.shape == (1, N)
    if x.dtype != jnp.bfloat16:
        x = x.astype(jnp.bfloat16)
    if w.dtype != jnp.bfloat16:
        w = w.astype(jnp.bfloat16)

    cap = 1024 if vmem_limit >= 96 * 1024 * 1024 else 512   # larger tiles on 128 MiB parts
    if K % 128 == 0:
        bk = min(K, cap)
        while K % bk:
            bk -= 128
    else:
        bk = K                                              # full-extent block (legal)
    bn = min(N, cap)
    while N % bn:
        bn -= 128

    bm = min(256, _round_up(M, 8))
    Mp = _round_up(M, bm)
    if Mp != M:
        x = jnp.pad(x, ((0, Mp - M), (0, 0)))

    out = pl.pallas_call(
        matmul_bias_kernel,
        out_shape=jax.ShapeDtypeStruct((Mp, N), out_dtype),
        grid_spec=pltpu.PrefetchScalarGridSpec(
            num_scalar_prefetch=0,
            grid=(Mp // bm, N // bn, K // bk),
            in_specs=[pl.BlockSpec((bm, bk), lambda i, j, k: (i, k)),
                      pl.BlockSpec((bk, bn), lambda i, j, k: (k, j)),
                      pl.BlockSpec((1, bn), lambda i, j, k: (0, j))],
            out_specs=pl.BlockSpec((bm, bn), lambda i, j, k: (i, j)),
            scratch_shapes=[pltpu.VMEM((bm, bn), jnp.float32)]),
        compiler_params=pltpu.CompilerParams(
            dimension_semantics=("parallel", "parallel", "arbitrary"),
            vmem_limit_bytes=vmem_limit),
    )(x, w, b)
    return out[:M] if Mp != M else out


def lstm_recurrence(gates_x, mask, w_hh, h0, c0, *, tb, tc, vmem_limit):
    """gates_x: (T_pad, Bp, 4Hp) bf16; mask: (T_pad, Bp, 1) f32.

    Returns (out bf16 (T_pad, Bp, Hp), h_n f32 (Bp, Hp), c_n f32 (Bp, Hp)).
    """
    T_pad, Bp, G = gates_x.shape
    Hp = G // 4
    # Fully unroll only while the carried (h, c) state comfortably fits the vreg file;
    # otherwise partial unroll to avoid spill blow-up (review).
    unroll = min(tc, 16) if tb * Hp * 8 <= 64 * 1024 else min(4, tc)
    kernel = functools.partial(lstm_recurrence_kernel, hidden_pad=Hp, chunk=tc,
                               unroll=unroll)
    out_shape = (jax.ShapeDtypeStruct((T_pad, Bp, Hp), jnp.bfloat16),
                 jax.ShapeDtypeStruct((Bp, Hp), jnp.float32),
                 jax.ShapeDtypeStruct((Bp, Hp), jnp.float32))

    def call(whh_spec_kwargs):
        grid_spec = pltpu.PrefetchScalarGridSpec(
            num_scalar_prefetch=0,
            grid=(Bp // tb, T_pad // tc),
            in_specs=[
                pl.BlockSpec((tc, tb, G), lambda b, t: (t, b, 0)),    # gates_x chunk (bf16)
                pl.BlockSpec((tc, tb, 1), lambda b, t: (t, b, 0)),    # validity mask chunk
                pl.BlockSpec((Hp, G), lambda b, t: (0, 0), **whh_spec_kwargs),  # resident W_hh
                pl.BlockSpec((tb, Hp), lambda b, t: (b, 0)),          # h0
                pl.BlockSpec((tb, Hp), lambda b, t: (b, 0)),          # c0
            ],
            out_specs=[
                pl.BlockSpec((tc, tb, Hp), lambda b, t: (t, b, 0)),   # padded output (bf16)
                pl.BlockSpec((tb, Hp), lambda b, t: (b, 0)),          # h_n
                pl.BlockSpec((tb, Hp), lambda b, t: (b, 0)),          # c_n
            ],
            scratch_shapes=[pltpu.VMEM((tb, Hp), jnp.float32),
                            pltpu.VMEM((tb, Hp), jnp.float32)])
        return pl.pallas_call(
            kernel, out_shape=out_shape, grid_spec=grid_spec,
            compiler_params=pltpu.CompilerParams(
                dimension_semantics=("parallel", "arbitrary"),
                vmem_limit_bytes=vmem_limit),
        )(gates_x, mask, w_hh, h0, c0)

    # Review: single-buffer the resident W_hh block (constant index_map saves a full
    # Hp x 4Hp buffer).  Fall back to the default double-buffered spec if this jax build
    # rejects pipeline_mode.
    if hasattr(pl, "Buffered"):
        try:
            return call({"pipeline_mode": pl.Buffered(1)})
        except Exception:
            pass
    return call({})


# ----------------------------------------------------------------------------
# One-time parameter preparation (hoisted out of the per-call forward)
# ----------------------------------------------------------------------------
def _pad_gates(w, H, Hp):
    """Pad a (..., 4*H) gate-major array to (..., 4*Hp), zero-padding each gate block."""
    lead = w.shape[:-1]
    w4 = w.reshape(lead + (4, H))
    return jnp.zeros(lead + (4, Hp), w.dtype).at[..., :H].set(w4).reshape(lead + (4 * Hp,))


def prepare_params(params):
    """Pad per gate to a 128-lane multiple and cast weights to bf16, once."""
    H = params["lstm"][0]["w_hh"].shape[0]
    Hp = _round_up(H, 128)
    V = params["fc_w"].shape[1]
    Vp = _round_up(V, 128)
    prep = {
        "H": H, "Hp": Hp, "V": V, "Vp": Vp,
        "num_layers": len(params["lstm"]),
        "embedding": params["embedding"].astype(jnp.bfloat16),
        "fc_w": jnp.zeros((Hp, Vp), jnp.bfloat16).at[:H, :V].set(
            params["fc_w"].astype(jnp.bfloat16)),
        "fc_b": jnp.zeros((1, Vp), jnp.float32).at[0, :V].set(
            params["fc_b"].astype(jnp.float32)),
        "lstm": [],
    }
    for layer, lw in enumerate(params["lstm"]):
        in_dim = lw["w_ih"].shape[0]
        w_ih = _pad_gates(lw["w_ih"].astype(jnp.float32), H, Hp)      # (in_dim, 4Hp)
        if layer > 0:   # layer input is the Hp-padded hidden output; pad the extra rows
            w_ih = jnp.zeros((Hp, 4 * Hp), w_ih.dtype).at[:in_dim].set(w_ih)
        w_hh = jnp.zeros((Hp, 4 * Hp), jnp.float32).at[:H].set(
            _pad_gates(lw["w_hh"].astype(jnp.float32), H, Hp))
        bias = jnp.zeros((1, 4 * Hp), jnp.float32).at[0].set(
            _pad_gates(lw["bias"].astype(jnp.float32), H, Hp))
        prep["lstm"].append({"w_ih": w_ih.astype(jnp.bfloat16),
                             "w_hh": w_hh.astype(jnp.bfloat16),
                             "bias": bias})
    return prep


# ----------------------------------------------------------------------------
# Forward pass
# ----------------------------------------------------------------------------
def lstm_model_forward(prep, input_ids, attention_mask, hidden=None):
    """Mirrors LSTM.forward (eval): {'logits': (B, T, V), 'hidden': (h_n, c_n)}."""
    cfg = _tpu_config()
    vmem_limit = cfg["vmem_limit"]
    num_layers = prep["num_layers"]
    B, T = input_ids.shape
    H, Hp = prep["H"], prep["Hp"]

    # ---- batch tiling: sublane-aligned; guarantee >=2 blocks on v7x (2 TensorCores) ----
    if B > 128:
        tb = 256 if (cfg["is_v6"] and B >= 256) else 128    # v6e MXU is 256 wide
        Bp = _round_up(B, tb)
    else:
        Bp = _round_up(B, 8)
        tb = Bp
        if cfg["num_tc"] >= 2 and Bp >= 16:                 # megacore split (v7x)
            Bp = _round_up(Bp, 32)
            tb = Bp // 2

    # ---- time chunking: derived from the scoped-VMEM budget ----------------------------
    tc = _pick_tc(T, tb, Hp, vmem_limit)
    T_pad = _round_up(T, tc)

    # ---- packed-sequence validity mask (padded rows / padded timesteps -> length 0) ----
    lengths = attention_mask.sum(axis=1).astype(jnp.int32)
    len_p = jnp.zeros((Bp,), jnp.int32).at[:B].set(lengths)
    mask = (jnp.arange(T_pad, dtype=jnp.int32)[:, None]
            < len_p[None, :]).astype(jnp.float32)[:, :, None]           # (T_pad, Bp, 1)

    # ---- embedding gather, directly time-major and already bf16 ------------------------
    ids_tm = jnp.zeros((T_pad, Bp), jnp.int32).at[:T, :B].set(input_ids.T)
    x_tm = jnp.take(prep["embedding"], ids_tm, axis=0)                  # (T_pad, Bp, E) bf16

    if hidden is None:
        h0 = c0 = None
    else:
        h0, c0 = hidden

    h_n_list, c_n_list = [], []
    for layer in range(num_layers):
        lw = prep["lstm"][layer]
        if hidden is None:                                  # init_hidden
            h0_p = jnp.zeros((Bp, Hp), jnp.float32)
            c0_p = jnp.zeros((Bp, Hp), jnp.float32)
        else:
            h0_p = jnp.zeros((Bp, Hp), jnp.float32).at[:B, :H].set(h0[layer])
            c0_p = jnp.zeros((Bp, Hp), jnp.float32).at[:B, :H].set(c0[layer])

        # hoisted input projection: one MXU GEMM over all timesteps, bf16 output slab
        d = x_tm.shape[-1]
        gates_x = matmul_bias(x_tm.reshape(T_pad * Bp, d), lw["w_ih"], lw["bias"],
                              out_dtype=jnp.bfloat16, vmem_limit=vmem_limit)
        gates_x = gates_x.reshape(T_pad, Bp, 4 * Hp)

        x_tm, h_n, c_n = lstm_recurrence(gates_x, mask, lw["w_hh"], h0_p, c0_p,
                                         tb=tb, tc=tc, vmem_limit=vmem_limit)
        h_n_list.append(h_n[:B, :H])
        c_n_list.append(c_n[:B, :H])
        # inter-layer dropout is identity in eval mode

    # self.dropout(output): identity at inference.  Transpose on the bf16 (half-width)
    # slab, then fc on the padded hidden dim (padded columns are exactly zero).
    out_bt = jnp.transpose(x_tm[:T, :B, :], (1, 0, 2)).reshape(B * T, Hp)
    logits = matmul_bias(out_bt, prep["fc_w"], prep["fc_b"],
                         out_dtype=jnp.float32, vmem_limit=vmem_limit)
    logits = logits.reshape(B, T, prep["Vp"])[:, :, :prep["V"]]
    hidden_out = (jnp.stack(h_n_list, axis=0), jnp.stack(c_n_list, axis=0))
    return {"logits": logits, "hidden": hidden_out}


# ----------------------------------------------------------------------------
# Deterministic parameter init (shapes from the module's __init__)
# ----------------------------------------------------------------------------
def init_params(key, vocab_size, embedding_dim, hidden_dim, num_layers):
    keys = jax.random.split(key, 3 + 4 * num_layers)
    k = 1.0 / math.sqrt(hidden_dim)
    params = {
        "embedding": jax.random.normal(keys[0], (vocab_size, embedding_dim), jnp.float32),
        "fc_w": jax.random.uniform(keys[1], (hidden_dim, vocab_size), jnp.float32, -k, k),
        "fc_b": jax.random.uniform(keys[2], (vocab_size,), jnp.float32, -k, k),
        "lstm": [],
    }
    for l in range(num_layers):
        in_dim = embedding_dim if l == 0 else hidden_dim
        kw = keys[3 + 4 * l: 7 + 4 * l]
        w_ih = jax.random.uniform(kw[0], (in_dim, 4 * hidden_dim), jnp.float32, -k, k)
        w_hh = jax.random.uniform(kw[1], (hidden_dim, 4 * hidden_dim), jnp.float32, -k, k)
        b_ih = jax.random.uniform(kw[2], (4 * hidden_dim,), jnp.float32, -k, k)
        b_hh = jax.random.uniform(kw[3], (4 * hidden_dim,), jnp.float32, -k, k)
        params["lstm"].append({"w_ih": w_ih, "w_hh": w_hh, "bias": b_ih + b_hh})
    return params


# ----------------------------------------------------------------------------
# Pure-JAX reference (packed-sequence LSTM semantics)
# ----------------------------------------------------------------------------
def reference_forward(params, input_ids, attention_mask, match_bf16=False):
    B, T = input_ids.shape
    H = params["lstm"][0]["w_hh"].shape[0]
    hi = jax.lax.Precision.HIGHEST

    def dot(a, b):
        if match_bf16:   # same math as the kernels: bf16 MXU inputs, f32 accumulation
            return jnp.dot(a.astype(jnp.bfloat16), b.astype(jnp.bfloat16),
                           preferred_element_type=jnp.float32)
        return jnp.dot(a, b, precision=hi)

    def maybe_bf16(v):   # kernels store the gates_x slab in bf16
        return v.astype(jnp.bfloat16).astype(jnp.float32) if match_bf16 else v

    lengths = attention_mask.sum(axis=1)
    x = jnp.take(params["embedding"], input_ids, axis=0)
    h_ns, c_ns = [], []
    for lw in params["lstm"]:
        h = jnp.zeros((B, H), jnp.float32)
        c = jnp.zeros((B, H), jnp.float32)
        outs = []
        for t in range(T):
            gx = maybe_bf16(dot(x[:, t, :], lw["w_ih"]) + lw["bias"])
            gates = gx + dot(h, lw["w_hh"])
            i_g = jax.nn.sigmoid(gates[:, :H])
            f_g = jax.nn.sigmoid(gates[:, H:2 * H])
            g_g = jnp.tanh(gates[:, 2 * H:3 * H])
            o_g = jax.nn.sigmoid(gates[:, 3 * H:])
            c_new = f_g * c + i_g * g_g
            h_new = o_g * jnp.tanh(c_new)
            valid = (t < lengths)[:, None]
            h = jnp.where(valid, h_new, h)
            c = jnp.where(valid, c_new, c)
            outs.append(jnp.where(valid, h_new, 0.0))
        x = jnp.stack(outs, axis=1)
        h_ns.append(h)
        c_ns.append(c)
    logits = (dot(x.reshape(B * T, H), params["fc_w"]) + params["fc_b"]).reshape(B, T, -1)
    return logits, (jnp.stack(h_ns), jnp.stack(c_ns))


# ----------------------------------------------------------------------------
if __name__ == "__main__":
    vocab_size, embedding_dim, hidden_dim, num_layers, dropout_rate = 64, 32, 32, 2, 0.1
    B, T = 2, 8

    key = jax.random.PRNGKey(0)
    pkey, ikey = jax.random.split(key)
    params = init_params(pkey, vocab_size, embedding_dim, hidden_dim, num_layers)
    prep = prepare_params(params)            # one-time weight pad/cast (hoisted per review)

    input_ids = jax.random.randint(ikey, (B, T), 0, vocab_size, dtype=jnp.int32)
    lengths = jnp.array([T, 5], dtype=jnp.int32)            # variable-length batch
    attention_mask = (jnp.arange(T)[None, :] < lengths[:, None]).astype(jnp.int32)

    out = lstm_model_forward(prep, input_ids, attention_mask)
    jax.block_until_ready(out)

    logits = out["logits"]                                   # (B, T, vocab_size)
    h_n, c_n = out["hidden"]                                 # (num_layers, B, H) each
    assert logits.shape == (B, T, vocab_size)
    assert h_n.shape == (num_layers, B, hidden_dim)
    assert c_n.shape == (num_layers, B, hidden_dim)

    # Implementation check: bf16-matched pure-JAX reference (same math as the kernels,
    # including the bf16 gates_x slab).
    ref_m, (hm, cm) = reference_forward(params, input_ids, attention_mask, match_bf16=True)
    assert float(jnp.max(jnp.abs(logits - ref_m))) < 1e-2
    assert float(jnp.max(jnp.abs(h_n - hm))) < 1e-2
    assert float(jnp.max(jnp.abs(c_n - cm))) < 1e-2

    # Semantics check: f32 HIGHEST-precision reference (bf16 MXU inputs drift slightly).
    ref_h, _ = reference_forward(params, input_ids, attention_mask, match_bf16=False)
    assert float(jnp.max(jnp.abs(logits - ref_h))) < 5e-2

    print("KERNEL_OK")
</pallas_src>

<mosaic_0001>
module attributes {stable_mosaic.version = 11 : i64} {
  func.func @matmul_bias_kernel(%arg0: i32, %arg1: i32, %arg2: i32, %arg3: memref<64x32xbf16, #tpu.memory_space<vmem>>, %arg4: memref<32x512xbf16, #tpu.memory_space<vmem>>, %arg5: memref<1x512xf32, #tpu.memory_space<vmem>>, %arg6: memref<64x512xbf16, #tpu.memory_space<vmem>>, %arg7: memref<64x512xf32, #tpu.memory_space<vmem>>) attributes {dimension_semantics = [#tpu.dimension_semantics<parallel>, #tpu.dimension_semantics<parallel>, #tpu.dimension_semantics<arbitrary>], iteration_bounds = array<i64: 1, 1, 1>, scalar_prefetch = 0 : i64, scratch_operands = 1 : i64, tpu.core_type = #tpu.core_type<tc>, window_params = [{transform_indices = @transform_0, window_bounds = array<i64: 64, 32>}, {transform_indices = @transform_1, window_bounds = array<i64: 32, 512>}, {transform_indices = @transform_2, window_bounds = array<i64: 1, 512>}, {transform_indices = @transform_3, window_bounds = array<i64: 64, 512>}]} {
    %c0_i32 = arith.constant 0 : i32
    %0 = arith.cmpi eq, %arg2, %c0_i32 : i32
    %1 = arith.extui %0 : i1 to i32
    %c0_i32_0 = arith.constant 0 : i32
    %2 = arith.cmpi ne, %1, %c0_i32_0 : i32
    scf.if %2 {
      %cst_10 = arith.constant 0.000000e+00 : f32
      %12 = vector.broadcast %cst_10 : f32 to vector<64x512xf32>
      %c0_11 = arith.constant 0 : index
      %c0_12 = arith.constant 0 : index
      %13 = vector.load %arg7[%c0_11, %c0_12] : memref<64x512xf32, #tpu.memory_space<vmem>>, vector<64x512xf32>
      tpu.vector_store %arg7[%c0_11, %c0_12], %12 {strides = array<i32>} : memref<64x512xf32, #tpu.memory_space<vmem>>, vector<64x512xf32>,
    } else {
    }
    %c0 = arith.constant 0 : index
    %c0_1 = arith.constant 0 : index
    %3 = vector.load %arg7[%c0, %c0_1] : memref<64x512xf32, #tpu.memory_space<vmem>>, vector<64x512xf32>
    %c0_2 = arith.constant 0 : index
    %c0_3 = arith.constant 0 : index
    %4 = vector.load %arg3[%c0_2, %c0_3] : memref<64x32xbf16, #tpu.memory_space<vmem>>, vector<64x32xbf16>
    %c0_4 = arith.constant 0 : index
    %c0_5 = arith.constant 0 : index
    %5 = vector.load %arg4[%c0_4, %c0_5] : memref<32x512xbf16, #tpu.memory_space<vmem>>, vector<32x512xbf16>
    %cst = arith.constant dense<0.000000e+00> : vector<64x512xf32>
    %6 = tpu.matmul %4, %5, %cst {dimension_numbers = #tpu.dot_dimension_numbers<[1], [0], [0], [1], [0, 0, 1, 1], [], []>} : vector<64x32xbf16>, vector<32x512xbf16>, vector<64x512xf32> -> vector<64x512xf32>
    %7 = arith.addf %3, %6 : vector<64x512xf32>
    %c0_6 = arith.constant 0 : index
    %c0_7 = arith.constant 0 : index
    %8 = vector.load %arg7[%c0_6, %c0_7] : memref<64x512xf32, #tpu.memory_space<vmem>>, vector<64x512xf32>
    tpu.vector_store %arg7[%c0_6, %c0_7], %7 {strides = array<i32>} : memref<64x512xf32, #tpu.memory_space<vmem>>, vector<64x512xf32>,
    %c0_i32_8 = arith.constant 0 : i32
    %9 = arith.cmpi eq, %arg2, %c0_i32_8 : i32
    %10 = arith.extui %9 : i1 to i32
    %c0_i32_9 = arith.constant 0 : i32
    %11 = arith.cmpi ne, %10, %c0_i32_9 : i32
    scf.if %11 {
      %c0_10 = arith.constant 0 : index
      %c0_11 = arith.constant 0 : index
      %12 = vector.load %arg7[%c0_10, %c0_11] : memref<64x512xf32, #tpu.memory_space<vmem>>, vector<64x512xf32>
      %c0_12 = arith.constant 0 : index
      %c0_13 = arith.constant 0 : index
      %13 = vector.load %arg5[%c0_12, %c0_13] : memref<1x512xf32, #tpu.memory_space<vmem>>, vector<1x512xf32>
      %14 = vector.broadcast %13 : vector<1x512xf32> to vector<64x512xf32>
      %15 = arith.addf %12, %14 : vector<64x512xf32>
      %16 = arith.truncf %15 : vector<64x512xf32> to vector<64x512xbf16>
      %c0_14 = arith.constant 0 : index
      %c0_15 = arith.constant 0 : index
      %17 = vector.load %arg6[%c0_14, %c0_15] : memref<64x512xbf16, #tpu.memory_space<vmem>>, vector<64x512xbf16>
      tpu.vector_store %arg6[%c0_14, %c0_15], %16 {strides = array<i32>} : memref<64x512xbf16, #tpu.memory_space<vmem>>, vector<64x512xbf16>,
    } else {
    }
    return
  }
  func.func @transform_0(%arg0: i32, %arg1: i32, %arg2: i32) -> (i32, i32) {
    %c0_i32 = arith.constant 0 : i32
    return %arg0, %arg2 : i32, i32
  }
  func.func @transform_1(%arg0: i32, %arg1: i32, %arg2: i32) -> (i32, i32) {
    %c0_i32 = arith.constant 0 : i32
    return %arg2, %arg1 : i32, i32
  }
  func.func @transform_2(%arg0: i32, %arg1: i32, %arg2: i32) -> (i32, i32) {
    %c0_i32 = arith.constant 0 : i32
    %c0_i32_0 = arith.constant 0 : i32
    return %c0_i32, %arg1 : i32, i32
  }
  func.func @transform_3(%arg0: i32, %arg1: i32, %arg2: i32) -> (i32, i32) {
    %c0_i32 = arith.constant 0 : i32
    return %arg0, %arg1 : i32, i32
  }
}

</mosaic_0001>

<bundles_post_ra>
// kernel: tpu_custom_call.1
= control target key start
LH: loop header
LB: loop body
LE: loop exit
PB: predicated region body
PF: predicated region fallthrough
CT: control target
= control target key end

     0   :  { %8 = vsyncpa [#allocation4], 0  ;;  %s943_s0 = inlined_call_operand.hbm [shape: bf16[64,32], index: 0, kind: input, shape index: {}]   ;;  %s944_s1 = inlined_call_operand.hbm [shape: bf16[32,512], index: 1, kind: input, shape index: {}]   ;;  %s945_s2 = inlined_call_operand.hbm [shape: f32[1,512], index: 2, kind: input, shape index: {}]   ;;  %s946_s3 = inlined_call_operand.hbm [shape: bf16[64,512], index: 3, kind: output, shape index: {}]  }
   0x1   :  { %9 = vsyncpa [#allocation7], 0 }
   0x2   :  { %10 = vsyncpa [#allocation5], 0  ;;  %s812_s12 = smov [#allocation6]   ;;  %s718_s16 = scalar_lea.hbm %s944_s1, 1024 }
   0x3   :  { %s28_s13 = sshll.u32 %s812_s12, 4  ;;  %p719_p0 = scmp.ne.s32.totalorder %s944_s1, %s718_s16  ;;  %s29_s13 = int_to_ptr.vmem [resolvable:$true] %s28_s13 }
   0x4   :  { %p722_p1 = scmp.lt.u32.totalorder %s718_s16, %s944_s1 }
   0x6   :  { %p724_p2 = pnand %p722_p1, %p719_p0 }
   0x8   :  { %727 = shalt.err (!%p724_p2)
}
   0x9   :  { %s728_s21 = scalar_lea.vmem %s29_s13, 1024  ;;  %p733_p4 = scmp.lt.s32.totalorder %s29_s13, %s29_s13 }
   0xa   :  { %p729_p3 = scmp.ne.s32.totalorder %s29_s13, %s728_s21  ;;  %p734_p5 = scmp.lt.s32.totalorder %s728_s21, %s728_s21 }
   0xc   :  { %p735_p6 = por %p734_p5, %p733_p4 }
   0xe   :  { %p736_p7 = pnand %p735_p6, %p729_p3 }
  0x10   :  { %739 = shalt.err (!%p736_p7)
}
  0x11   :  { %s813_s22 = smov 256   ;;  %s814_s23 = smov 16  }
  0x12   :  { %34 = dma.hbm_to_vmem [thread:$0]  %s944_s1, 1024, %s29_s13, [#allocation7], %s813_s22, %s813_s22, %s814_s23  }
  0x13   :  { %s815_s26 = smov [#allocation3]   ;;  %s740_s30 = scalar_lea.hbm %s943_s0, 512 }
  0x14   :  { %s16_s27 = sshll.u32 %s815_s26, 4  ;;  %p741_p8 = scmp.ne.s32.totalorder %s943_s0, %s740_s30  ;;  %s17_s27 = int_to_ptr.vmem [resolvable:$true] %s16_s27 }
  0x15   :  { %p744_p9 = scmp.lt.u32.totalorder %s740_s30, %s943_s0 }
  0x17   :  { %p746_p10 = pnand %p744_p9, %p741_p8 }
  0x19   :  { %749 = shalt.err (!%p746_p10)
}
  0x1a   :  { %s750_s8 = scalar_lea.vmem %s17_s27, 512  ;;  %p755_p12 = scmp.lt.s32.totalorder %s17_s27, %s17_s27 }
  0x1b   :  { %p751_p11 = scmp.ne.s32.totalorder %s17_s27, %s750_s8  ;;  %p756_p13 = scmp.lt.s32.totalorder %s750_s8, %s750_s8 }
  0x1d   :  { %p757_p0 = por %p756_p13, %p755_p12 }
  0x1f   :  { %p758_p1 = pnand %p757_p0, %p751_p11 }
  0x21   :  { %761 = shalt.err (!%p758_p1)
}
  0x22   :  { %s816_s1 = smov 64   ;;  %s817_s9 = smov 4  }
  0x23   :  { %22 = dma.hbm_to_vmem [thread:$0]  %s943_s0, 512, %s17_s27, [#allocation4], %s816_s1, %s816_s1, %s817_s9  }
  0x24   :  { %s818_s12 = smov [#allocation8]   ;;  %s762_s16 = scalar_lea.hbm %s945_s2, 64 }
  0x25   :  { %s41_s13 = sshll.u32 %s818_s12, 4  ;;  %p763_p2 = scmp.ne.s32.totalorder %s945_s2, %s762_s16  ;;  %s42_s13 = int_to_ptr.vmem [resolvable:$true] %s41_s13 }
  0x26   :  { %p766_p3 = scmp.lt.u32.totalorder %s762_s16, %s945_s2 }
  0x28   :  { %p768_p4 = pnand %p766_p3, %p763_p2 }
  0x2a   :  { %771 = shalt.err (!%p768_p4)
}
  0x2b   :  { %s772_s21 = scalar_lea.vmem %s42_s13, 64  ;;  %p777_p6 = scmp.lt.s32.totalorder %s42_s13, %s42_s13 }
  0x2c   :  { %p773_p5 = scmp.ne.s32.totalorder %s42_s13, %s772_s21  ;;  %p778_p7 = scmp.lt.s32.totalorder %s772_s21, %s772_s21 }
  0x2e   :  { %p779_p8 = por %p778_p7, %p777_p6 }
  0x30   :  { %p780_p9 = pnand %p779_p8, %p773_p5 }
  0x32   :  { %783 = shalt.err (!%p780_p9)
}
  0x33   :  { %44 = dma.hbm_to_vmem [thread:$0]  %s945_s2, 64, %s42_s13, [#allocation7]  }
  0x34   :  { %806 = dma.done.wait [#allocation4], 512  }
  0x35   :  { %807 = vsyncadd [#allocation4], 4294966784 }
  0x36   :  { %808 = dma.done.wait [#allocation7], 1088  }
  0x37   :  { %809 = vsyncadd [#allocation7], 4294966208  ;;  %v819_v0 = vmov 0   ;;  %v702_v1 = vld [vmem:[#allocation6 + $0x4] ss:$16 sps:$4 sm:$0xff]   ;;  %vm199_vm0 = vcmask 261120   ;;  %v459_v13 = vlaneseq }
  0x38   :  { %244 = vmatprep.mubr.bf16.mxu0 %v819_v0  ;;  %317 = vmatprep.mubr.bf16.mxu1 %v819_v0  ;;  %v704_v2 = vld [vmem:[#allocation6 + $0xc] ss:$16 sps:$4 sm:$0xff]   ;;  %v706_v3 = vld [vmem:[#allocation6] ss:$16 sps:$4 sm:$0xff]   ;;  %v707_v4 = vld [vmem:[#allocation6 + $0x8] ss:$16 sps:$4 sm:$0xff]  }
  0x39   :  { %212 = vmatprep.subr.bf16.mxu0 %v702_v1  ;;  %285 = vmatprep.subr.bf16.mxu1 %v704_v2  ;;  %v708_v5 = vld [vmem:[#allocation6 + $0x24] ss:$16 sps:$4 sm:$0xff]   ;;  %v710_v6 = vld [vmem:[#allocation6 + $0x2c] ss:$16 sps:$4 sm:$0xff]   ;;  %v712_v7 = vld [vmem:[#allocation6 + $0x20] ss:$16 sps:$4 sm:$0xff]  }
  0x3a   :  { %213 = vmatpush1.bf16.msra.mxu0 %v706_v3  ;;  %286 = vmatpush1.bf16.msra.mxu1 %v707_v4  ;;  %v713_v8 = vld [vmem:[#allocation6 + $0x28] ss:$16 sps:$4 sm:$0xff]   ;;  %v714_v9 = vld [vmem:[#allocation3] sm:$0xff]   ;;  %v716_v11 = vld [vmem:[#allocation3 + $0x10] sm:$0xff]   ;;  %v460_v14 = vshrl.u32 %v459_v13, 7  ;;  %s820_s2 = smov [#allocation9]  }
  0x3b   :  { %214 = vmatprep.subr.bf16.mxu0 %v708_v5  ;;  %287 = vmatprep.subr.bf16.mxu1 %v710_v6  ;;  %v715_v10 = vld [vmem:[#allocation3 + $0x8] sm:$0xff]   ;;  %v717_v12 = vld [vmem:[#allocation3 + $0x18] sm:$0xff]   ;;  %v457_v17 = vld [vmem:[#allocation8] sm:$0xf]  ;;  %s628_s25 = sshll.u32 %s820_s2, 4  ;;  %s629_s25 = int_to_ptr.vmem [resolvable:$true] %s628_s25 }
  0x3c   :  { %v461_v15 = vsub.s32 0, %v460_v14  ;;  %v469_v16 = vsub.s32 2, %v460_v14  ;;  %v465_v18 = vsub.s32 1, %v460_v14  ;;  %v473_v19 = vsub.s32 3, %v460_v14  ;;  %s784_s26 = scalar_lea.vmem %s629_s25, 2048  ;;  %p789_p11 = scmp.lt.s32.totalorder %s629_s25, %s629_s25 }
  0x3d   :  { %p785_p10 = scmp.ne.s32.totalorder %s629_s25, %s784_s26  ;;  %p790_p12 = scmp.lt.s32.totalorder %s784_s26, %s784_s26 }
  0x3e   :  { %215 = vmatpush1.bf16.msra.mxu0 %v712_v7  ;;  %288 = vmatpush1.bf16.msra.mxu1 %v713_v8  ;;  %v888_v20 = vrot.slane %v457_v17, %v461_v15  ;;  %v890_v21 = vrot.slane %v457_v17, %v469_v16  ;;  %v892_v22 = vrot.slane %v457_v17, %v465_v18 }
  0x3f   :  { %v894_v23 = vrot.slane %v457_v17, %v473_v19  ;;  %p791_p13 = por %p790_p12, %p789_p11 }
  0x41   :  { %653 = vmatmul.mubr.msk.bf16.vlgmr.msra.gmra.mrb[0].mxu0 %vm199_vm0, %v714_v9  ;;  %657 = vmatmul.mubr.msk.bf16.vlgmr.msra.gmra.mrb[0].mxu1 %vm199_vm0, %v714_v9  ;;  %p792_p0 = pnand %p791_p13, %p785_p10 }
  0x42   :  { %254 = vmatprep.mubr.bf16.mxu0 %v819_v0  ;;  %327 = vmatprep.mubr.bf16.mxu1 %v819_v0 }
  0x49   :  { %654 = vmatmul.mubr.msk.bf16.gmra.mrb[4].mxu0 %vm199_vm0, %v715_v10  ;;  %658 = vmatmul.mubr.msk.bf16.gmra.mrb[4].mxu1 %vm199_vm0, %v715_v10 }
  0x4a   :  { %264 = vmatprep.mubr.bf16.mxu0 %v819_v0  ;;  %337 = vmatprep.mubr.bf16.mxu1 %v819_v0 }
  0x51   :  { %655 = vmatmul.mubr.msk.bf16.gmra.mrb[8].mxu0 %vm199_vm0, %v716_v11  ;;  %659 = vmatmul.mubr.msk.bf16.gmra.mrb[8].mxu1 %vm199_vm0, %v716_v11 }
  0x52   :  { %274 = vmatprep.mubr.bf16.mxu0 %v819_v0  ;;  %347 = vmatprep.mubr.bf16.mxu1 %v819_v0 }
  0x59   :  { %656 = vmatmul.mubr.msk.bf16.gmra.mrb[12].mxu0 %vm199_vm0, %v717_v12  ;;  %660 = vmatmul.mubr.msk.bf16.gmra.mrb[12].mxu1 %vm199_vm0, %v717_v12 }
 0x114   :  { %v246_v24 = vpop.f32.mrb[0].mxu0  ;;  %v319_v25 = vpop.f32.mrb[0].mxu1 }
 0x115   :  { %v479_v26 = vadd.f32 %v888_v20, %v246_v24  ;;  %v481_v27 = vadd.f32 %v890_v21, %v319_v25  ;;  %v248_v28 = vpop.f32.mrb[1].mxu0  ;;  %v321_v29 = vpop.f32.mrb[1].mxu1 }
 0x116   :  { %v480_v30 = vadd.f32 %v892_v22, %v248_v28  ;;  %v482_v31 = vadd.f32 %v894_v23, %v321_v29  ;;  %v250_v32 = vpop.f32.mrb[2].mxu0  ;;  %v323_v33 = vpop.f32.mrb[2].mxu1 }
 0x117   :  { %v483_v34 = vadd.f32 %v888_v20, %v250_v32  ;;  %v485_v35 = vadd.f32 %v890_v21, %v323_v33  ;;  %v252_v36 = vpop.f32.mrb[3].mxu0  ;;  %v325_v37 = vpop.f32.mrb[3].mxu1 }
 0x118   :  { %v677_v38 = vpack.c.bf16 %v480_v30, %v479_v26  ;;  %v678_v39 = vpack.c.bf16 %v482_v31, %v481_v27  ;;  %v484_v40 = vadd.f32 %v892_v22, %v252_v36  ;;  %v486_v41 = vadd.f32 %v894_v23, %v325_v37 }
 0x11a   :  { %607 = vst [vmem:[#allocation9] sm:$0xff] %v677_v38  ;;  %608 = vst [vmem:[#allocation9 + $0x8] sm:$0xff] %v678_v39  ;;  %v679_v42 = vpack.c.bf16 %v484_v40, %v483_v34  ;;  %v680_v43 = vpack.c.bf16 %v486_v41, %v485_v35 }
 0x11c   :  { %609 = vst [vmem:[#allocation9 + $0x10] sm:$0xff] %v679_v42  ;;  %610 = vst [vmem:[#allocation9 + $0x18] sm:$0xff] %v680_v43  ;;  %v256_v44 = vpop.f32.mrb[4].mxu0  ;;  %v329_v45 = vpop.f32.mrb[4].mxu1 }
 0x11d   :  { %v487_v46 = vadd.f32 %v888_v20, %v256_v44  ;;  %v489_v47 = vadd.f32 %v890_v21, %v329_v45  ;;  %v258_v48 = vpop.f32.mrb[5].mxu0  ;;  %v331_v49 = vpop.f32.mrb[5].mxu1 }
 0x11e   :  { %v488_v50 = vadd.f32 %v892_v22, %v258_v48  ;;  %v490_v51 = vadd.f32 %v894_v23, %v331_v49  ;;  %v260_v52 = vpop.f32.mrb[6].mxu0  ;;  %v333_v53 = vpop.f32.mrb[6].mxu1 }
 0x11f   :  { %v491_v54 = vadd.f32 %v888_v20, %v260_v52  ;;  %v493_v55 = vadd.f32 %v890_v21, %v333_v53  ;;  %v262_v56 = vpop.f32.mrb[7].mxu0  ;;  %v335_v57 = vpop.f32.mrb[7].mxu1 }
 0x120   :  { %v681_v58 = vpack.c.bf16 %v488_v50, %v487_v46  ;;  %v682_v59 = vpack.c.bf16 %v490_v51, %v489_v47  ;;  %v492_v60 = vadd.f32 %v892_v22, %v262_v56  ;;  %v494_v61 = vadd.f32 %v894_v23, %v335_v57 }
 0x122   :  { %611 = vst [vmem:[#allocation9 + $0x20] sm:$0xff] %v681_v58  ;;  %612 = vst [vmem:[#allocation9 + $0x28] sm:$0xff] %v682_v59  ;;  %v683_v62 = vpack.c.bf16 %v492_v60, %v491_v54  ;;  %v684_v63 = vpack.c.bf16 %v494_v61, %v493_v55 }
 0x124   :  { %613 = vst [vmem:[#allocation9 + $0x30] sm:$0xff] %v683_v62  ;;  %614 = vst [vmem:[#allocation9 + $0x38] sm:$0xff] %v684_v63  ;;  %v266_v0 = vpop.f32.mrb[8].mxu0  ;;  %v339_v1 = vpop.f32.mrb[8].mxu1 }
 0x125   :  { %v495_v2 = vadd.f32 %v888_v20, %v266_v0  ;;  %v497_v3 = vadd.f32 %v890_v21, %v339_v1  ;;  %v268_v4 = vpop.f32.mrb[9].mxu0  ;;  %v341_v5 = vpop.f32.mrb[9].mxu1 }
 0x126   :  { %v496_v6 = vadd.f32 %v892_v22, %v268_v4  ;;  %v498_v7 = vadd.f32 %v894_v23, %v341_v5  ;;  %v270_v8 = vpop.f32.mrb[10].mxu0  ;;  %v343_v9 = vpop.f32.mrb[10].mxu1 }
 0x127   :  { %v499_v10 = vadd.f32 %v888_v20, %v270_v8  ;;  %v501_v11 = vadd.f32 %v890_v21, %v343_v9  ;;  %v272_v12 = vpop.f32.mrb[11].mxu0  ;;  %v345_v13 = vpop.f32.mrb[11].mxu1 }
 0x128   :  { %v685_v14 = vpack.c.bf16 %v496_v6, %v495_v2  ;;  %v686_v15 = vpack.c.bf16 %v498_v7, %v497_v3  ;;  %v500_v16 = vadd.f32 %v892_v22, %v272_v12  ;;  %v502_v17 = vadd.f32 %v894_v23, %v345_v13 }
 0x12a   :  { %615 = vst [vmem:[#allocation9 + $0x40] sm:$0xff] %v685_v14  ;;  %616 = vst [vmem:[#allocation9 + $0x48] sm:$0xff] %v686_v15  ;;  %v687_v18 = vpack.c.bf16 %v500_v16, %v499_v10  ;;  %v688_v19 = vpack.c.bf16 %v502_v17, %v501_v11 }
 0x12c   :  { %617 = vst [vmem:[#allocation9 + $0x50] sm:$0xff] %v687_v18  ;;  %618 = vst [vmem:[#allocation9 + $0x58] sm:$0xff] %v688_v19  ;;  %v276_v24 = vpop.f32.mrb[12].mxu0  ;;  %v349_v25 = vpop.f32.mrb[12].mxu1 }
 0x12d   :  { %v503_v26 = vadd.f32 %v888_v20, %v276_v24  ;;  %v505_v27 = vadd.f32 %v890_v21, %v349_v25  ;;  %v278_v28 = vpop.f32.mrb[13].mxu0  ;;  %v351_v29 = vpop.f32.mrb[13].mxu1 }
 0x12e   :  { %v504_v30 = vadd.f32 %v892_v22, %v278_v28  ;;  %v506_v31 = vadd.f32 %v894_v23, %v351_v29  ;;  %v280_v32 = vpop.f32.mrb[14].mxu0  ;;  %v353_v33 = vpop.f32.mrb[14].mxu1 }
 0x12f   :  { %v507_v34 = vadd.f32 %v888_v20, %v280_v32  ;;  %v509_v35 = vadd.f32 %v890_v21, %v353_v33  ;;  %v282_v36 = vpop.f32.mrb[15].mxu0  ;;  %v355_v37 = vpop.f32.mrb[15].mxu1 }
 0x130   :  { %v689_v38 = vpack.c.bf16 %v504_v30, %v503_v26  ;;  %v690_v39 = vpack.c.bf16 %v506_v31, %v505_v27  ;;  %v508_v40 = vadd.f32 %v892_v22, %v282_v36  ;;  %v510_v41 = vadd.f32 %v894_v23, %v355_v37 }
 0x132   :  { %619 = vst [vmem:[#allocation9 + $0x60] sm:$0xff] %v689_v38  ;;  %620 = vst [vmem:[#allocation9 + $0x68] sm:$0xff] %v690_v39  ;;  %v691_v42 = vpack.c.bf16 %v508_v40, %v507_v34  ;;  %v692_v43 = vpack.c.bf16 %v510_v41, %v509_v35 }
 0x134   :  { %621 = vst [vmem:[#allocation9 + $0x70] sm:$0xff] %v691_v42  ;;  %622 = vst [vmem:[#allocation9 + $0x78] sm:$0xff] %v692_v43 }
 0x135   :  { %795 = shalt.err (!%p792_p0)
}
 0x136   :  { %s796_s29 = scalar_lea.hbm %s946_s3, 2048 }
 0x137   :  { %p797_p1 = scmp.ne.s32.totalorder %s946_s3, %s796_s29  ;;  %p800_p2 = scmp.lt.u32.totalorder %s796_s29, %s946_s3 }
 0x139   :  { %p802_p3 = pnand %p800_p2, %p797_p1 }
 0x13b   :  { %805 = shalt.err (!%p802_p3)
}
 0x13c   :  { %634 = dma.vmem_to_hbm [thread:$0]  %s629_s25, 2048, %s946_s3, [#allocation5], %s813_s22, %s813_s22, %s814_s23  }
 0x13d   :  { %810 = dma.done.wait [#allocation5], 2048  }
 0x13e   :  { %811 = vsyncadd [#allocation5], 4294965248 }
 0x13f   :  { %638 = vsyncpa [#allocation4], 1 }
 0x140   :  { %639 = vsyncpa [#allocation7], 1 }
 0x141   :  { %640 = vsyncpa [#allocation5], 1 }

</bundles_post_ra>
